<compile_context>
chip_gen: v7x
topology: tpu7x:2x2x1
jax: 0.10.0
libtpu: 0.0.40
codegen_flags: <defaults>
</compile_context>

<pallas_src>
import functools

import jax
import jax.numpy as jnp
import numpy as np
from jax.experimental import pallas as pl
from jax.experimental.pallas import tpu as pltpu  # noqa: F401  (gridless call, no manual DMA needed)


_GROUPS = ("dis", "pmi", "top")


# ------------------------------- helpers ------------------------------------ #

def _round_up(x, m):
    return ((x + m - 1) // m) * m


def _pad_dim(x, axis, target):
    pad = target - x.shape[axis]
    if pad == 0:
        return x
    widths = [(0, 0)] * x.ndim
    widths[axis] = (0, pad)
    return jnp.pad(x, widths)


def _pad2(x, rows, cols):
    return _pad_dim(_pad_dim(x, 0, rows), 1, cols)


# ----------------------------- fused Pallas kernel --------------------------- #

def _fused_kernel(hd_ref, self_ref, ns_ref, a_ref, scat_ref, wdf_ref, bdf_ref,
                  out_ref, *, dp, scale):
    """Whole Merge_Model forward in one gridless kernel.

    hd_ref   : (N, Dp)       dst-node embeddings
    self_ref : (N, 3*Dp)     dst embeddings pre-projected through the 3 self weights (+bias)
    ns_ref   : (3, NS, Dp)   src embeddings pre-projected through the 3 neighbor weights
    a_ref    : (3, N, NS)    row-normalized (mean) adjacency per channel
    scat_ref : (B, N)        token-count matrix / L (sequence mean as a matmul)
    wdf_ref  : (Dp, Cp)      folded head weight  (W_dense @ W_fc)
    bdf_ref  : (1, Cp)       folded head bias    (b_dense @ W_fc + b_fc)
    out_ref  : (B, Cp)
    """
    h_dst = hd_ref[...]                                              # (N, Dp)
    self_all = self_ref[...]                                         # (N, 3Dp)

    # ---- three SAGEConv channels (Dropout(0.8) identity at eval) ----------- #
    hs = []
    for c in range(3):                                               # static unroll
        h_neigh = jnp.dot(a_ref[c], ns_ref[c],
                          preferred_element_type=jnp.float32)        # (N, Dp) = A @ (emb_src @ W_neigh)
        hs.append(self_all[:, c * dp:(c + 1) * dp] + h_neigh)

    # ---- scaled dot-product attention over the 3 channels, mean-fused ------ #
    s = [[None] * 3 for _ in range(3)]
    for c in range(3):                                               # symmetric: 6 lane reductions
        for k in range(c, 3):
            v = jnp.sum(hs[c] * hs[k], axis=-1, keepdims=True) * scale
            s[c][k] = v
            s[k][c] = v
    acc = jnp.zeros_like(h_dst)
    for c in range(3):
        m = jnp.maximum(jnp.maximum(s[c][0], s[c][1]), s[c][2])
        e = [jnp.exp(s[c][k] - m) for k in range(3)]                 # stable softmax over channels
        inv = pl.reciprocal(e[0] + e[1] + e[2])                      # exact reciprocal
        acc = acc + (e[0] * hs[0] + e[1] * hs[1] + e[2] * hs[2]) * inv
    doc_plus_dst = acc * (1.0 / 3.0) + h_dst                         # (N, Dp)

    # ---- head: seq mean (count-matrix matmul) -> folded dense+fc ----------- #
    doc_in = jnp.dot(scat_ref[...], doc_plus_dst,
                     preferred_element_type=jnp.float32)             # (B, Dp)
    out_ref[...] = (jnp.dot(doc_in, wdf_ref[...],
                            preferred_element_type=jnp.float32) + bdf_ref[...])


# ------------------------------ one-time prepack ----------------------------- #

def prepack_params(params):
    """Pad / pre-project / fold all weights once at init (kept in f32)."""
    D = params["embedding"].shape[1]
    C = params["w_fc"].shape[1]
    Dp = _round_up(D, 128)                                            # 300 -> 384
    Cp = _round_up(C, 128)                                            # 5   -> 128

    emb = _pad_dim(params["embedding"].astype(jnp.float32), 1, Dp)    # (V, Dp)

    w_self_cat = jnp.concatenate([_pad2(params[f"w_self_{g}"], Dp, Dp)
                                  for g in _GROUPS], axis=1)          # (Dp, 3Dp)
    b_cat = jnp.concatenate([_pad_dim(params[f"b_{g}"], 1, Dp)
                             for g in _GROUPS], axis=1)               # (1, 3Dp)
    self_table = emb @ w_self_cat + b_cat                             # (V, 3Dp)   emb @ W_self + b

    neigh_tables = jnp.stack([emb @ _pad2(params[f"w_neigh_{g}"], Dp, Dp)
                              for g in _GROUPS])                      # (3, V, Dp)  emb @ W_neigh

    w_df = _pad2(params["w_dense"] @ params["w_fc"], Dp, Cp)          # (Dp, Cp)
    b_df = _pad_dim(params["b_dense"] @ params["w_fc"] + params["b_fc"], 1, Cp)

    packed = {"emb": emb, "self_table": self_table, "neigh_tables": neigh_tables,
              "w_df": w_df, "b_df": b_df}
    return packed, D, C


# ------------------------------ model wrapper -------------------------------- #

@functools.partial(jax.jit, static_argnames=("feat_dim", "num_classes"))
def merge_model_forward(packed, adj, ids, x_batch, *, feat_dim, num_classes):
    emb = packed["emb"]
    Dp = emb.shape[1]
    Cp = packed["w_df"].shape[1]

    # tiny gathers from the prepacked tables (XLA glue inside the same jit)
    h_dst = jnp.take(emb, ids["dst"], axis=0)                         # (N, Dp)
    self_all = jnp.take(packed["self_table"], ids["dst"], axis=0)     # (N, 3Dp)
    N = h_dst.shape[0]

    NS = _round_up(max(adj[g].shape[1] for g in _GROUPS), 8)          # sublane-aligned, NOT 128-padded
    ns = jnp.stack([_pad_dim(jnp.take(packed["neigh_tables"][i], ids[g], axis=0), 0, NS)
                    for i, g in enumerate(_GROUPS)])                  # (3, NS, Dp)
    a = jnp.stack([_pad_dim(adj[g].astype(jnp.float32), 1, NS)
                   for g in _GROUPS])                                 # (3, N, NS)

    # sequence mean as a matmul: scat[b, n] = count_t(x_batch[b, t] == n) / L.
    # Tokens pointing at the zero pad row (index N) contribute nothing -> dropped.
    B, L = x_batch.shape
    scat = (jax.nn.one_hot(x_batch, N + 1, dtype=jnp.float32)
            .sum(axis=1)[:, :N] / float(L))                           # (B, N)

    flops = (3 * 2 * N * NS * Dp       # neighbor aggregation matmuls
             + 6 * 2 * N * Dp          # attention scores
             + 18 * N * Dp             # context combine
             + 2 * B * N * Dp          # sequence-mean matmul
             + 2 * B * Dp * Cp)        # folded head matmul
    bytes_accessed = 4 * (h_dst.size + self_all.size + ns.size + a.size
                          + scat.size + packed["w_df"].size + packed["b_df"].size
                          + B * Cp)

    kernel = functools.partial(_fused_kernel, dp=Dp, scale=float(feat_dim) ** -0.5)
    out = pl.pallas_call(
        kernel,
        out_shape=jax.ShapeDtypeStruct((B, Cp), jnp.float32),
        cost_estimate=pl.CostEstimate(flops=flops, transcendentals=9 * N,
                                      bytes_accessed=bytes_accessed),
        # no grid: whole working set (<1 MiB) fits VMEM as single whole-array
        # blocks; any tiling would only add per-step overhead.
    )(h_dst, self_all, ns, a, scat, packed["w_df"], packed["b_df"])

    return out[:, :num_classes]                                       # strip class-dim padding


# ------------------------------ pure-JAX reference -------------------------- #

def reference_forward(params, adj, ids, x_batch):
    emb = params["embedding"]
    h_dst = emb[ids["dst"]]
    outs = []
    for g in _GROUPS:
        h_s = emb[ids[g]]
        h_neigh = adj[g] @ h_s
        cat = jnp.concatenate([h_dst, h_neigh], axis=1)
        w = jnp.concatenate([params[f"w_self_{g}"], params[f"w_neigh_{g}"]], axis=0)
        outs.append(cat @ w + params[f"b_{g}"])
    x = jnp.stack(outs, axis=1)                                       # (N, 3, D)
    scale = x.shape[-1] ** -0.5
    scores = jnp.einsum("ncd,nkd->nck", x, x) * scale
    p = jax.nn.softmax(scores, axis=-1)
    ctx = jnp.einsum("nck,nkd->ncd", p, x)
    doc = ctx.mean(axis=1) + h_dst
    table = jnp.concatenate([doc, jnp.zeros((1, doc.shape[-1]), jnp.float32)], axis=0)
    seq = table[x_batch]
    y = seq @ params["w_dense"] + params["b_dense"]
    doc_out = y.mean(axis=1)
    return doc_out @ params["w_fc"] + params["b_fc"]


# ----------------------------------- main ----------------------------------- #

if __name__ == "__main__":
    V, D = 24, 300          # vocab size, embedding / GCN feature dim (dense_layer = Linear(300, 300))
    N_DST, N_SRC = 8, 12    # block dst / src node counts
    B, L, C = 4, 10, 5      # batch, sequence length, num_classes

    key = jax.random.PRNGKey(0)
    ks = jax.random.split(key, 24)
    ki = iter(ks)

    params = {"embedding": jax.random.normal(next(ki), (V, D), jnp.float32) * 0.1}
    for g in _GROUPS:
        params[f"w_self_{g}"] = jax.random.normal(next(ki), (D, D), jnp.float32) * 0.05
        params[f"w_neigh_{g}"] = jax.random.normal(next(ki), (D, D), jnp.float32) * 0.05
        params[f"b_{g}"] = jax.random.normal(next(ki), (1, D), jnp.float32) * 0.01
    params["w_dense"] = jax.random.normal(next(ki), (D, D), jnp.float32) * 0.05
    params["b_dense"] = jax.random.normal(next(ki), (1, D), jnp.float32) * 0.01
    params["w_fc"] = jax.random.normal(next(ki), (D, C), jnp.float32) * 0.05
    params["b_fc"] = jax.random.normal(next(ki), (1, C), jnp.float32) * 0.01

    # synthetic DGL blocks: node-id maps + dense row-normalized (mean) adjacency
    ids = {
        "dst": jax.random.randint(next(ki), (N_DST,), 0, V),
        "dis": jax.random.randint(next(ki), (N_SRC,), 0, V),
        "pmi": jax.random.randint(next(ki), (N_SRC,), 0, V),
        "top": jax.random.randint(next(ki), (N_SRC,), 0, V),
    }
    adj = {}
    for g in _GROUPS:
        a = (jax.random.uniform(next(ki), (N_DST, N_SRC)) < 0.35).astype(jnp.float32)
        a = a.at[:, 0].set(1.0)                                  # guarantee >=1 neighbor per dst
        adj[g] = a / jnp.maximum(a.sum(axis=1, keepdims=True), 1.0)

    # token sequences index the (N_DST + 1)-row graph_word_embeddings table (last row = pad zeros)
    x_batch = jax.random.randint(next(ki), (B, L), 0, N_DST + 1)

    # one-time prepack (weights padded / pre-projected / head-folded)
    packed, feat_dim, num_classes = prepack_params(params)
    packed = jax.tree_util.tree_map(jax.block_until_ready, packed)

    out = merge_model_forward(packed, adj, ids, x_batch,
                              feat_dim=feat_dim, num_classes=num_classes)
    out = jax.block_until_ready(out)

    ref = jax.block_until_ready(reference_forward(params, adj, ids, x_batch))
    assert out.shape == (B, C), out.shape
    np.testing.assert_allclose(np.asarray(out), np.asarray(ref), rtol=1e-3, atol=1e-3)

    print("KERNEL_OK")
</pallas_src>

<mosaic_0001>
module attributes {stable_mosaic.version = 11 : i64} {
  func.func @_fused_kernel(%arg0: memref<8x384xf32, #tpu.memory_space<vmem>>, %arg1: memref<8x1152xf32, #tpu.memory_space<vmem>>, %arg2: memref<3x16x384xf32, #tpu.memory_space<vmem>>, %arg3: memref<3x8x16xf32, #tpu.memory_space<vmem>>, %arg4: memref<4x8xf32, #tpu.memory_space<vmem>>, %arg5: memref<384x128xf32, #tpu.memory_space<vmem>>, %arg6: memref<1x128xf32, #tpu.memory_space<vmem>>, %arg7: memref<4x128xf32, #tpu.memory_space<vmem>>) attributes {dimension_semantics = [], scalar_prefetch = 0 : i64, scratch_operands = 0 : i64, tpu.core_type = #tpu.core_type<tc>} {
    %c0 = arith.constant 0 : index
    %c0_0 = arith.constant 0 : index
    %0 = vector.load %arg0[%c0, %c0_0] : memref<8x384xf32, #tpu.memory_space<vmem>>, vector<8x384xf32>
    %c0_1 = arith.constant 0 : index
    %c0_2 = arith.constant 0 : index
    %1 = vector.load %arg1[%c0_1, %c0_2] : memref<8x1152xf32, #tpu.memory_space<vmem>>, vector<8x1152xf32>
    %c0_3 = arith.constant 0 : index
    %c0_4 = arith.constant 0 : index
    %c0_5 = arith.constant 0 : index
    %2 = vector.load %arg3[%c0_3, %c0_4, %c0_5] : memref<3x8x16xf32, #tpu.memory_space<vmem>>, vector<1x8x16xf32>
    %3 = vector.shape_cast %2 : vector<1x8x16xf32> to vector<8x16xf32>
    %c0_6 = arith.constant 0 : index
    %c0_7 = arith.constant 0 : index
    %c0_8 = arith.constant 0 : index
    %4 = vector.load %arg2[%c0_6, %c0_7, %c0_8] : memref<3x16x384xf32, #tpu.memory_space<vmem>>, vector<1x16x384xf32>
    %5 = vector.shape_cast %4 : vector<1x16x384xf32> to vector<16x384xf32>
    %cst = arith.constant dense<0.000000e+00> : vector<8x384xf32>
    %6 = tpu.matmul %3, %5, %cst {dimension_numbers = #tpu.dot_dimension_numbers<[1], [0], [0], [1], [0, 0, 1, 1], [], []>} : vector<8x16xf32>, vector<16x384xf32>, vector<8x384xf32> -> vector<8x384xf32>
    %7 = vector.extract_strided_slice %1 {offsets = [0, 0], sizes = [8, 384], strides = [1, 1]} : vector<8x1152xf32> to vector<8x384xf32>
    %8 = arith.addf %7, %6 : vector<8x384xf32>
    %c1 = arith.constant 1 : index
    %c0_9 = arith.constant 0 : index
    %c0_10 = arith.constant 0 : index
    %9 = vector.load %arg3[%c1, %c0_9, %c0_10] : memref<3x8x16xf32, #tpu.memory_space<vmem>>, vector<1x8x16xf32>
    %10 = vector.shape_cast %9 : vector<1x8x16xf32> to vector<8x16xf32>
    %c1_11 = arith.constant 1 : index
    %c0_12 = arith.constant 0 : index
    %c0_13 = arith.constant 0 : index
    %11 = vector.load %arg2[%c1_11, %c0_12, %c0_13] : memref<3x16x384xf32, #tpu.memory_space<vmem>>, vector<1x16x384xf32>
    %12 = vector.shape_cast %11 : vector<1x16x384xf32> to vector<16x384xf32>
    %cst_14 = arith.constant dense<0.000000e+00> : vector<8x384xf32>
    %13 = tpu.matmul %10, %12, %cst_14 {dimension_numbers = #tpu.dot_dimension_numbers<[1], [0], [0], [1], [0, 0, 1, 1], [], []>} : vector<8x16xf32>, vector<16x384xf32>, vector<8x384xf32> -> vector<8x384xf32>
    %14 = vector.extract_strided_slice %1 {offsets = [0, 384], sizes = [8, 384], strides = [1, 1]} : vector<8x1152xf32> to vector<8x384xf32>
    %15 = arith.addf %14, %13 : vector<8x384xf32>
    %c2 = arith.constant 2 : index
    %c0_15 = arith.constant 0 : index
    %c0_16 = arith.constant 0 : index
    %16 = vector.load %arg3[%c2, %c0_15, %c0_16] : memref<3x8x16xf32, #tpu.memory_space<vmem>>, vector<1x8x16xf32>
    %17 = vector.shape_cast %16 : vector<1x8x16xf32> to vector<8x16xf32>
    %c2_17 = arith.constant 2 : index
    %c0_18 = arith.constant 0 : index
    %c0_19 = arith.constant 0 : index
    %18 = vector.load %arg2[%c2_17, %c0_18, %c0_19] : memref<3x16x384xf32, #tpu.memory_space<vmem>>, vector<1x16x384xf32>
    %19 = vector.shape_cast %18 : vector<1x16x384xf32> to vector<16x384xf32>
    %cst_20 = arith.constant dense<0.000000e+00> : vector<8x384xf32>
    %20 = tpu.matmul %17, %19, %cst_20 {dimension_numbers = #tpu.dot_dimension_numbers<[1], [0], [0], [1], [0, 0, 1, 1], [], []>} : vector<8x16xf32>, vector<16x384xf32>, vector<8x384xf32> -> vector<8x384xf32>
    %21 = vector.extract_strided_slice %1 {offsets = [0, 768], sizes = [8, 384], strides = [1, 1]} : vector<8x1152xf32> to vector<8x384xf32>
    %22 = arith.addf %21, %20 : vector<8x384xf32>
    %23 = arith.mulf %8, %8 : vector<8x384xf32>
    %cst_21 = arith.constant dense<0.000000e+00> : vector<8xf32>
    %24 = vector.multi_reduction <add>, %23, %cst_21 [1] : vector<8x384xf32> to vector<8xf32>
    %25 = vector.shape_cast %24 : vector<8xf32> to vector<8x1xf32>
    %cst_22 = arith.constant 0.0577350259 : f32
    %26 = vector.broadcast %cst_22 : f32 to vector<8x1xf32>
    %27 = arith.mulf %25, %26 : vector<8x1xf32>
    %28 = arith.mulf %8, %15 : vector<8x384xf32>
    %cst_23 = arith.constant dense<0.000000e+00> : vector<8xf32>
    %29 = vector.multi_reduction <add>, %28, %cst_23 [1] : vector<8x384xf32> to vector<8xf32>
    %30 = vector.shape_cast %29 : vector<8xf32> to vector<8x1xf32>
    %cst_24 = arith.constant 0.0577350259 : f32
    %31 = vector.broadcast %cst_24 : f32 to vector<8x1xf32>
    %32 = arith.mulf %30, %31 : vector<8x1xf32>
    %33 = arith.mulf %8, %22 : vector<8x384xf32>
    %cst_25 = arith.constant dense<0.000000e+00> : vector<8xf32>
    %34 = vector.multi_reduction <add>, %33, %cst_25 [1] : vector<8x384xf32> to vector<8xf32>
    %35 = vector.shape_cast %34 : vector<8xf32> to vector<8x1xf32>
    %cst_26 = arith.constant 0.0577350259 : f32
    %36 = vector.broadcast %cst_26 : f32 to vector<8x1xf32>
    %37 = arith.mulf %35, %36 : vector<8x1xf32>
    %38 = arith.mulf %15, %15 : vector<8x384xf32>
    %cst_27 = arith.constant dense<0.000000e+00> : vector<8xf32>
    %39 = vector.multi_reduction <add>, %38, %cst_27 [1] : vector<8x384xf32> to vector<8xf32>
    %40 = vector.shape_cast %39 : vector<8xf32> to vector<8x1xf32>
    %cst_28 = arith.constant 0.0577350259 : f32
    %41 = vector.broadcast %cst_28 : f32 to vector<8x1xf32>
    %42 = arith.mulf %40, %41 : vector<8x1xf32>
    %43 = arith.mulf %15, %22 : vector<8x384xf32>
    %cst_29 = arith.constant dense<0.000000e+00> : vector<8xf32>
    %44 = vector.multi_reduction <add>, %43, %cst_29 [1] : vector<8x384xf32> to vector<8xf32>
    %45 = vector.shape_cast %44 : vector<8xf32> to vector<8x1xf32>
    %cst_30 = arith.constant 0.0577350259 : f32
    %46 = vector.broadcast %cst_30 : f32 to vector<8x1xf32>
    %47 = arith.mulf %45, %46 : vector<8x1xf32>
    %48 = arith.mulf %22, %22 : vector<8x384xf32>
    %cst_31 = arith.constant dense<0.000000e+00> : vector<8xf32>
    %49 = vector.multi_reduction <add>, %48, %cst_31 [1] : vector<8x384xf32> to vector<8xf32>
    %50 = vector.shape_cast %49 : vector<8xf32> to vector<8x1xf32>
    %cst_32 = arith.constant 0.0577350259 : f32
    %51 = vector.broadcast %cst_32 : f32 to vector<8x1xf32>
    %52 = arith.mulf %50, %51 : vector<8x1xf32>
    %cst_33 = arith.constant 0.000000e+00 : f32
    %53 = vector.broadcast %cst_33 : f32 to vector<8x384xf32>
    %54 = arith.maximumf %27, %32 : vector<8x1xf32>
    %55 = arith.maximumf %54, %37 : vector<8x1xf32>
    %56 = arith.subf %27, %55 : vector<8x1xf32>
    %57 = math.exp %56 : vector<8x1xf32>
    %58 = arith.subf %32, %55 : vector<8x1xf32>
    %59 = math.exp %58 : vector<8x1xf32>
    %60 = arith.subf %37, %55 : vector<8x1xf32>
    %61 = math.exp %60 : vector<8x1xf32>
    %62 = arith.addf %57, %59 : vector<8x1xf32>
    %63 = arith.addf %62, %61 : vector<8x1xf32>
    %64 = tpu.reciprocal %63 : vector<8x1xf32> -> vector<8x1xf32>
    %65 = vector.broadcast %57 : vector<8x1xf32> to vector<8x384xf32>
    %66 = arith.mulf %65, %8 : vector<8x384xf32>
    %67 = vector.broadcast %59 : vector<8x1xf32> to vector<8x384xf32>
    %68 = arith.mulf %67, %15 : vector<8x384xf32>
    %69 = arith.addf %66, %68 : vector<8x384xf32>
    %70 = vector.broadcast %61 : vector<8x1xf32> to vector<8x384xf32>
    %71 = arith.mulf %70, %22 : vector<8x384xf32>
    %72 = arith.addf %69, %71 : vector<8x384xf32>
    %73 = vector.broadcast %64 : vector<8x1xf32> to vector<8x384xf32>
    %74 = arith.mulf %72, %73 : vector<8x384xf32>
    %75 = arith.addf %53, %74 : vector<8x384xf32>
    %76 = arith.maximumf %32, %42 : vector<8x1xf32>
    %77 = arith.maximumf %76, %47 : vector<8x1xf32>
    %78 = arith.subf %32, %77 : vector<8x1xf32>
    %79 = math.exp %78 : vector<8x1xf32>
    %80 = arith.subf %42, %77 : vector<8x1xf32>
    %81 = math.exp %80 : vector<8x1xf32>
    %82 = arith.subf %47, %77 : vector<8x1xf32>
    %83 = math.exp %82 : vector<8x1xf32>
    %84 = arith.addf %79, %81 : vector<8x1xf32>
    %85 = arith.addf %84, %83 : vector<8x1xf32>
    %86 = tpu.reciprocal %85 : vector<8x1xf32> -> vector<8x1xf32>
    %87 = vector.broadcast %79 : vector<8x1xf32> to vector<8x384xf32>
    %88 = arith.mulf %87, %8 : vector<8x384xf32>
    %89 = vector.broadcast %81 : vector<8x1xf32> to vector<8x384xf32>
    %90 = arith.mulf %89, %15 : vector<8x384xf32>
    %91 = arith.addf %88, %90 : vector<8x384xf32>
    %92 = vector.broadcast %83 : vector<8x1xf32> to vector<8x384xf32>
    %93 = arith.mulf %92, %22 : vector<8x384xf32>
    %94 = arith.addf %91, %93 : vector<8x384xf32>
    %95 = vector.broadcast %86 : vector<8x1xf32> to vector<8x384xf32>
    %96 = arith.mulf %94, %95 : vector<8x384xf32>
    %97 = arith.addf %75, %96 : vector<8x384xf32>
    %98 = arith.maximumf %37, %47 : vector<8x1xf32>
    %99 = arith.maximumf %98, %52 : vector<8x1xf32>
    %100 = arith.subf %37, %99 : vector<8x1xf32>
    %101 = math.exp %100 : vector<8x1xf32>
    %102 = arith.subf %47, %99 : vector<8x1xf32>
    %103 = math.exp %102 : vector<8x1xf32>
    %104 = arith.subf %52, %99 : vector<8x1xf32>
    %105 = math.exp %104 : vector<8x1xf32>
    %106 = arith.addf %101, %103 : vector<8x1xf32>
    %107 = arith.addf %106, %105 : vector<8x1xf32>
    %108 = tpu.reciprocal %107 : vector<8x1xf32> -> vector<8x1xf32>
    %109 = vector.broadcast %101 : vector<8x1xf32> to vector<8x384xf32>
    %110 = arith.mulf %109, %8 : vector<8x384xf32>
    %111 = vector.broadcast %103 : vector<8x1xf32> to vector<8x384xf32>
    %112 = arith.mulf %111, %15 : vector<8x384xf32>
    %113 = arith.addf %110, %112 : vector<8x384xf32>
    %114 = vector.broadcast %105 : vector<8x1xf32> to vector<8x384xf32>
    %115 = arith.mulf %114, %22 : vector<8x384xf32>
    %116 = arith.addf %113, %115 : vector<8x384xf32>
    %117 = vector.broadcast %108 : vector<8x1xf32> to vector<8x384xf32>
    %118 = arith.mulf %116, %117 : vector<8x384xf32>
    %119 = arith.addf %97, %118 : vector<8x384xf32>
    %cst_34 = arith.constant 0.333333343 : f32
    %120 = vector.broadcast %cst_34 : f32 to vector<8x384xf32>
    %121 = arith.mulf %119, %120 : vector<8x384xf32>
    %122 = arith.addf %121, %0 : vector<8x384xf32>
    %c0_35 = arith.constant 0 : index
    %c0_36 = arith.constant 0 : index
    %123 = vector.load %arg4[%c0_35, %c0_36] : memref<4x8xf32, #tpu.memory_space<vmem>>, vector<4x8xf32>
    %cst_37 = arith.constant dense<0.000000e+00> : vector<4x384xf32>
    %124 = tpu.matmul %123, %122, %cst_37 {dimension_numbers = #tpu.dot_dimension_numbers<[1], [0], [0], [1], [0, 0, 1, 1], [], []>} : vector<4x8xf32>, vector<8x384xf32>, vector<4x384xf32> -> vector<4x384xf32>
    %c0_38 = arith.constant 0 : index
    %c0_39 = arith.constant 0 : index
    %125 = vector.load %arg5[%c0_38, %c0_39] : memref<384x128xf32, #tpu.memory_space<vmem>>, vector<384x128xf32>
    %cst_40 = arith.constant dense<0.000000e+00> : vector<4x128xf32>
    %126 = tpu.matmul %124, %125, %cst_40 {dimension_numbers = #tpu.dot_dimension_numbers<[1], [0], [0], [1], [0, 0, 1, 1], [], []>} : vector<4x384xf32>, vector<384x128xf32>, vector<4x128xf32> -> vector<4x128xf32>
    %c0_41 = arith.constant 0 : index
    %c0_42 = arith.constant 0 : index
    %127 = vector.load %arg6[%c0_41, %c0_42] : memref<1x128xf32, #tpu.memory_space<vmem>>, vector<1x128xf32>
    %128 = vector.broadcast %127 : vector<1x128xf32> to vector<4x128xf32>
    %129 = arith.addf %126, %128 : vector<4x128xf32>
    %c0_43 = arith.constant 0 : index
    %c0_44 = arith.constant 0 : index
    %130 = vector.load %arg7[%c0_43, %c0_44] : memref<4x128xf32, #tpu.memory_space<vmem>>, vector<4x128xf32>
    tpu.vector_store %arg7[%c0_43, %c0_44], %129 {strides = array<i32>} : memref<4x128xf32, #tpu.memory_space<vmem>>, vector<4x128xf32>,
    return
  }
}

</mosaic_0001>

<bundles_post_ra>
// kernel: merge_model_forward.1
= control target key start
LH: loop header
LB: loop body
LE: loop exit
PB: predicated region body
PF: predicated region fallthrough
CT: control target
= control target key end

     0   :  { %v1297_v3 = vmov 0.0|0.0   ;;  %vm1298_vm0 = vmmov 0   ;;  %v1299_v8 = vmov 0.0   ;;  %vm46_vm1 = vcmask 130048   ;;  %s1715_s0 = inlined_call_operand.vmem [shape: f32[8,384], index: 0, kind: input, shape index: {}]   ;;  %s1716_s1 = inlined_call_operand.vmem [shape: f32[8,1152], index: 1, kind: input, shape index: {}]   ;;  %s1717_s2 = inlined_call_operand.vmem [shape: f32[3,16,384], index: 2, kind: input, shape index: {}]   ;;  %s1718_s3 = inlined_call_operand.vmem [shape: f32[3,8,16], index: 3, kind: input, shape index: {}]   ;;  %s1719_s4 = inlined_call_operand.vmem [shape: f32[4,8], index: 4, kind: input, shape index: {}]   ;;  %s1720_s5 = inlined_call_operand.vmem [shape: f32[384,128], index: 5, kind: input, shape index: {}]   ;;  %s1721_s6 = inlined_call_operand.vmem [shape: f32[1,128], index: 6, kind: input, shape index: {}]   ;;  %s1722_s7 = inlined_call_operand.hbm [shape: f32[4,128], index: 7, kind: output, shape index: {}]  }
   0x1   :  { %v41_v0 = vld [vmem:[%s1717_s2 + $0x8] sm:$0xff]  ;;  %v44_v1 = vld [vmem:[%s1717_s2 + $0x20] sm:$0xff]  ;;  %v42_v2 = vld [vmem:[%s1717_s2 + $0x10] sm:$0xff]  ;;  %1172 = vmatprep.subr.bf16.mxu1 %v1297_v3  ;;  %1111 = vmatprep.mubr.msk.f32.mxu1 %vm1298_vm0, %v1299_v8 }
   0x2   :  { %v1168_v4 = vpack.c.bf16 %v44_v1, %v41_v0  ;;  %v45_v5 = vld [vmem:[%s1717_s2 + $0x28] sm:$0xff]  ;;  %v40_v6 = vld [vmem:[%s1717_s2] sm:$0xff]  ;;  %v43_v7 = vld [vmem:[%s1717_s2 + $0x18] sm:$0xff]  ;;  %114 = vmatprep.mubr.f32.mxu0 %v1299_v8 }
   0x3   :  { %v1173_v9 = vpack.c.bf16 %v45_v5, %v42_v2  ;;  %v1170_v10 = vpack.c.bf16 %v43_v7, %v40_v6  ;;  %v1025_v11 = vld [vmem:[%s1717_s2 + $0x38] sm:$0xff]  ;;  %v1028_v12 = vld [vmem:[%s1717_s2 + $0x50] sm:$0xff]  ;;  %v1026_v14 = vld [vmem:[%s1717_s2 + $0x40] sm:$0xff] }
   0x4   :  { %1169 = vmatprep.subr.bf16.mxu0 %v1168_v4  ;;  %v1175_v13 = vpack.c.bf16 %v1028_v12, %v1025_v11  ;;  %v1029_v15 = vld [vmem:[%s1717_s2 + $0x58] sm:$0xff]  ;;  %v1024_v16 = vld [vmem:[%s1717_s2 + $0x30] sm:$0xff]  ;;  %v39_v17 = vld [vmem:[%s1718_s3] sm:$0xff] }
   0x5   :  { %1174 = vmatpush3.bf16.msra.mxu1 %v1173_v9  ;;  %1171 = vmatpush1.bf16.msra.mxu0 %v1170_v10  ;;  %v1180_v18 = vpack.c.bf16 %v1029_v15, %v1026_v14  ;;  %v1027_v19 = vld [vmem:[%s1717_s2 + $0x48] sm:$0xff]  ;;  %v1037_v22 = vld [vmem:[%s1717_s2 + $0x80] sm:$0xff]  ;;  %v1035_v23 = vld [vmem:[%s1717_s2 + $0x70] sm:$0xff] }
   0x6   :  { %v1034_v20 = vld [vmem:[%s1717_s2 + $0x68] sm:$0xff]  ;;  %1179 = vmatprep.subr.bf16.mxu1 %v1297_v3  ;;  %1176 = vmatprep.subr.bf16.mxu0 %v1175_v13  ;;  %v1177_v21 = vpack.c.bf16 %v1027_v19, %v1024_v16  ;;  %v1033_v26 = vld [vmem:[%s1717_s2 + $0x60] sm:$0xff]  ;;  %v1036_v27 = vld [vmem:[%s1717_s2 + $0x78] sm:$0xff] }
   0x7   :  { %v1038_v24 = vld [vmem:[%s1717_s2 + $0x88] sm:$0xff]  ;;  %v1182_v25 = vpack.c.bf16 %v1037_v22, %v1034_v20 }
   0x8   :  { %1112 = vmatmul.mubr.msk.f32.vlgmr.msra.gmra.mrb[0].mxu1 %vm46_vm1, %v39_v17  ;;  %1021 = vmatmul.mubr.msk.f32.vlgmr.msra.gmra.mrb[0].mxu0 %vm46_vm1, %v39_v17 }
   0x9   :  { %12 = vsyncpa [#allocation3], 0  ;;  %1181 = vmatpush3.bf16.msra.mxu1 %v1180_v18  ;;  %1178 = vmatpush1.bf16.msra.mxu0 %v1177_v21  ;;  %v1023_v28 = vld [vmem:[%s1718_s3 + $0x8] sm:$0xff]  ;;  %v1187_v29 = vpack.c.bf16 %v1038_v24, %v1035_v23  ;;  %v1184_v30 = vpack.c.bf16 %v1036_v27, %v1033_v26  ;;  %v1032_v31 = vld [vmem:[%s1718_s3 + $0x10] sm:$0xff]  ;;  %vm666_vm2 = vcmask 64512  }
   0xa   :  { %1118 = vmatprep.mubr.msk.f32.mxu1 %vm1298_vm0, %v1299_v8  ;;  %270 = vmatprep.mubr.f32.mxu0 %v1299_v8  ;;  %v30_v32 = vld [vmem:[%s1716_s1] sm:$0xff]  ;;  %v32_v33 = vld [vmem:[%s1716_s1 + $0x10] sm:$0xff]  ;;  %v31_v34 = vld [vmem:[%s1716_s1 + $0x8] sm:$0xff] }
   0xb   :  { %1186 = vmatprep.subr.bf16.mxu1 %v1297_v3  ;;  %1183 = vmatprep.subr.bf16.mxu0 %v1182_v25  ;;  %v33_v42 = vld [vmem:[%s1716_s1 + $0x18] sm:$0xff]  ;;  %v35_v43 = vld [vmem:[%s1716_s1 + $0x28] sm:$0xff]  ;;  %v34_v44 = vld [vmem:[%s1716_s1 + $0x20] sm:$0xff] }
   0xc   :  { %1119 = vmatmul.mubr.msk.f32.vlgmr.msra.gmra.mrb[2].mxu1 %vm46_vm1, %v1023_v28  ;;  %1030 = vmatmul.mubr.msk.f32.vlgmr.msra.gmra.mrb[2].mxu0 %vm46_vm1, %v1023_v28  ;;  %v38_v55 = vld [vmem:[%s1716_s1 + $0x40] sm:$0xff]  ;;  %v36_v56 = vld [vmem:[%s1716_s1 + $0x30] sm:$0xff]  ;;  %v37_v58 = vld [vmem:[%s1716_s1 + $0x38] sm:$0xff] }
   0xd   :  { %1188 = vmatpush3.bf16.msra.mxu1 %v1187_v29  ;;  %1185 = vmatpush1.bf16.msra.mxu0 %v1184_v30 }
   0xe   :  { %1125 = vmatprep.mubr.msk.f32.mxu1 %vm1298_vm0, %v1299_v8  ;;  %426 = vmatprep.mubr.f32.mxu0 %v1299_v8 }
   0xf   :  { %1128 = vmatprep.subr.mxu1 %v1299_v8 }
  0x10   :  { %1126 = vmatmul.mubr.msk.f32.vlgmr.msra.gmra.mrb[4].mxu1 %vm46_vm1, %v1032_v31  ;;  %1039 = vmatmul.mubr.msk.f32.vlgmr.msra.gmra.mrb[4].mxu0 %vm46_vm1, %v1032_v31 }
  0x11   :  { %734 = vmatprep.mubr.f32.mxu0 %v1299_v8  ;;  %1130 = vmatprep.mubr.msk.f32.mxu1 %vm1298_vm0, %v1299_v8 }
  0xdb   :  { %v116_v35 = vpop.f32.mrb[0].mxu0  ;;  %v187_v36 = vpop.f32.mrb[0].mxu1 }
  0xdc   :  { %v1435_v37 = vadd.f32 %v116_v35, %v30_v32  ;;  %v118_v38 = vpop.f32.mrb[1].mxu0  ;;  %v1437_v39 = vadd.f32 %v187_v36, %v32_v33  ;;  %v1113_v40 = vpop.f32.mrb[1].mxu1 }
  0xdd   :  { %v1439_v41 = vadd.f32 %v118_v38, %v31_v34 }
  0xde   :  { %v506_v45 = vmul.f32 %v1435_v37, %v1435_v37  ;;  %v508_v49 = vmul.f32 %v1437_v39, %v1437_v39 }
  0xdf   :  { %v343_v46 = vpop.f32.mrb[2].mxu1  ;;  %v272_v47 = vpop.f32.mrb[2].mxu0  ;;  %v507_v48 = vmul.f32 %v1439_v41, %v1439_v41 }
  0xe0   :  { %v1456_v50 = vadd.f32 %v272_v47, %v33_v42  ;;  %v274_v51 = vpop.f32.mrb[3].mxu0  ;;  %v1120_v52 = vpop.f32.mrb[3].mxu1  ;;  %v1458_v53 = vadd.f32 %v343_v46, %v35_v43 }
  0xe1   :  { %v1460_v54 = vadd.f32 %v274_v51, %v34_v44  ;;  %v509_v57 = vadd.f32 %v507_v48, %v506_v45 }
  0xe2   :  { %v530_v59 = vmul.f32 %v1456_v50, %v1456_v50  ;;  %v514_v60 = vmul.f32 %v1456_v50, %v1435_v37  ;;  %v532_v1 = vmul.f32 %v1458_v53, %v1458_v53  ;;  %v516_v11 = vmul.f32 %v1458_v53, %v1437_v39 }
  0xe3   :  { %v499_v61 = vpop.f32.mrb[4].mxu1  ;;  %v428_v62 = vpop.f32.mrb[4].mxu0  ;;  %v510_v63 = vadd.f32 %v509_v57, %v508_v49  ;;  %v531_v0 = vmul.f32 %v1460_v54, %v1460_v54  ;;  %v515_v2 = vmul.f32 %v1460_v54, %v1439_v41 }
  0xe4   :  { %v1481_v4 = vadd.f32 %v499_v61, %v38_v55  ;;  %v1483_v5 = vadd.f32 %v428_v62, %v36_v56  ;;  %v430_v6 = vpop.f32.mrb[5].mxu0  ;;  %v1127_v7 = vpop.f32.mrb[5].mxu1 }
  0xe5   :  { %v1485_v9 = vadd.f32 %v430_v6, %v37_v58  ;;  %511 = vadd.xlane.f32.xlu0 %v510_v63  ;;  %v533_v10 = vadd.f32 %v531_v0, %v530_v59  ;;  %v517_v12 = vadd.f32 %v515_v2, %v514_v60 }
  0xe6   :  { %v522_v13 = vmul.f32 %v1483_v5, %v1435_v37  ;;  %v538_v14 = vmul.f32 %v1483_v5, %v1456_v50  ;;  %v524_v19 = vmul.f32 %v1481_v4, %v1437_v39  ;;  %v546_v20 = vmul.f32 %v1483_v5, %v1483_v5 }
  0xe7   :  { %v534_v15 = vadd.f32 %v533_v10, %v532_v1  ;;  %v518_v16 = vadd.f32 %v517_v12, %v516_v11  ;;  %v523_v17 = vmul.f32 %v1485_v9, %v1439_v41  ;;  %v539_v18 = vmul.f32 %v1485_v9, %v1460_v54 }
  0xe8   :  { %v547_v21 = vmul.f32 %v1485_v9, %v1485_v9  ;;  %v540_v23 = vmul.f32 %v1481_v4, %v1458_v53  ;;  %v548_v27 = vmul.f32 %v1481_v4, %v1481_v4 }
  0xe9   :  { %535 = vadd.xlane.f32.xlu1 %v534_v15  ;;  %519 = vadd.xlane.f32.xlu0 %v518_v16  ;;  %v525_v22 = vadd.f32 %v523_v17, %v522_v13  ;;  %v541_v24 = vadd.f32 %v539_v18, %v538_v14 }
  0xea   :  { %v549_v28 = vadd.f32 %v547_v21, %v546_v20 }
  0xeb   :  { %v526_v25 = vadd.f32 %v525_v22, %v524_v19  ;;  %v542_v26 = vadd.f32 %v541_v24, %v540_v23 }
  0xec   :  { %v550_v29 = vadd.f32 %v549_v28, %v548_v27 }
  0xed   :  { %527 = vadd.xlane.f32.xlu1 %v526_v25  ;;  %543 = vadd.xlane.f32.xlu0 %v542_v26 }
  0xf1   :  { %551 = vadd.xlane.f32.xlu1 %v550_v29 }
 0x172   :  { %v512_v30 = vpop.xlane.xlu0 %511 }
 0x173   :  { %v513_v35 = vmul.f32 0.057735026, %v512_v30 }
 0x176   :  { %v536_v31 = vpop.xlane.xlu1 %535  ;;  %v520_v32 = vpop.xlane.xlu0 %519 }
 0x177   :  { %v537_v33 = vmul.f32 0.057735026, %v536_v31  ;;  %v521_v34 = vmul.f32 0.057735026, %v520_v32 }
 0x179   :  { %v554_v40 = vmax.f32 %v513_v35, %v521_v34  ;;  %v589_v42 = vmax.f32 %v521_v34, %v537_v33 }
 0x17a   :  { %v528_v36 = vpop.xlane.xlu1 %527  ;;  %v544_v38 = vpop.xlane.xlu0 %543 }
 0x17b   :  { %v529_v43 = vmul.f32 0.057735026, %v528_v36  ;;  %v545_v44 = vmul.f32 0.057735026, %v544_v38 }
 0x17d   :  { %v555_v45 = vmax.f32 %v554_v40, %v529_v43  ;;  %v590_v46 = vmax.f32 %v589_v42, %v545_v44  ;;  %v624_v58 = vmax.f32 %v529_v43, %v545_v44 }
 0x17e   :  { %v552_v47 = vpop.xlane.xlu1 %551 }
 0x17f   :  { %v556_v48 = vsub.f32 %v513_v35, %v555_v45  ;;  %v559_v49 = vsub.f32 %v521_v34, %v555_v45  ;;  %v562_v51 = vsub.f32 %v529_v43, %v555_v45  ;;  %v591_v52 = vsub.f32 %v521_v34, %v590_v46 }
 0x180   :  { %v594_v55 = vsub.f32 %v537_v33, %v590_v46  ;;  %v597_v56 = vsub.f32 %v545_v44, %v590_v46  ;;  %v553_v57 = vmul.f32 0.057735026, %v552_v47 }
 0x181   :  { %v557_v59 = vmul.f32 1.442695, %v556_v48  ;;  %v560_v60 = vmul.f32 1.442695, %v559_v49  ;;  %v563_v61 = vmul.f32 1.442695, %v562_v51 }
 0x182   :  { %v592_v62 = vmul.f32 1.442695, %v591_v52  ;;  %v625_v63 = vmax.f32 %v624_v58, %v553_v57  ;;  %v595_v0 = vmul.f32 1.442695, %v594_v55  ;;  %v598_v1 = vmul.f32 1.442695, %v597_v56 }
 0x183   :  { %1249 = vpow2.f32 %v557_v59 }
 0x184   :  { %1251 = vpow2.f32 %v560_v60  ;;  %v626_v2 = vsub.f32 %v529_v43, %v625_v63  ;;  %v629_v6 = vsub.f32 %v545_v44, %v625_v63  ;;  %v632_v7 = vsub.f32 %v553_v57, %v625_v63 }
 0x185   :  { %1253 = vpow2.f32 %v563_v61 }
 0x186   :  { %1255 = vpow2.f32 %v592_v62  ;;  %v627_v10 = vmul.f32 1.442695, %v626_v2  ;;  %v630_v11 = vmul.f32 1.442695, %v629_v6  ;;  %v633_v12 = vmul.f32 1.442695, %v632_v7 }
 0x187   :  { %1257 = vpow2.f32 %v595_v0 }
 0x188   :  { %1259 = vpow2.f32 %v598_v1 }
 0x189   :  { %1261 = vpow2.f32 %v627_v10 }
 0x18a   :  { %1263 = vpow2.f32 %v630_v11 }
 0x18b   :  { %1265 = vpow2.f32 %v633_v12 }
 0x18d   :  { %v1250_v13 = vpop.eup %1249 }
 0x18e   :  { %v1252_v14 = vpop.eup %1251  ;;  %v569_v23 = vmul.f32 %v1250_v13, %v1439_v41  ;;  %v570_v25 = vmul.f32 %v1250_v13, %v1437_v39  ;;  %v568_v34 = vmul.f32 %v1250_v13, %v1435_v37 }
 0x18f   :  { %v1254_v15 = vpop.eup %1253  ;;  %v565_v16 = vadd.f32 %v1252_v14, %v1250_v13  ;;  %v572_v24 = vmul.f32 %v1252_v14, %v1460_v54  ;;  %v573_v30 = vmul.f32 %v1252_v14, %v1458_v53  ;;  %v571_v35 = vmul.f32 %v1252_v14, %v1456_v50 }
 0x190   :  { %v1256_v17 = vpop.eup %1255  ;;  %v578_v33 = vmul.f32 %v1254_v15, %v1485_v9  ;;  %v579_v58 = vmul.f32 %v1254_v15, %v1481_v4 }
 0x191   :  { %v1258_v18 = vpop.eup %1257  ;;  %v566_v19 = vadd.f32 %v1254_v15, %v565_v16  ;;  %v604_v28 = vmul.f32 %v1256_v17, %v1439_v41  ;;  %v575_v36 = vadd.f32 %v572_v24, %v569_v23  ;;  %v605_v40 = vmul.f32 %v1256_v17, %v1437_v39 }
 0x192   :  { %v1260_v20 = vpop.eup %1259  ;;  %v600_v21 = vadd.f32 %v1258_v18, %v1256_v17  ;;  %v607_v29 = vmul.f32 %v1258_v18, %v1460_v54  ;;  %v608_v42 = vmul.f32 %v1258_v18, %v1458_v53  ;;  %v576_v44 = vadd.f32 %v573_v30, %v570_v25  ;;  %v27_v30 = vld [vmem:[%s1715_s0] sm:$0xff] }
 0x193   :  { %v1262_v22 = vpop.eup %1261  ;;  %1267 = vrcp.f32 %v566_v19  ;;  %v603_v45 = vmul.f32 %v1256_v17, %v1435_v37  ;;  %v606_v46 = vmul.f32 %v1258_v18, %v1456_v50  ;;  %v574_v52 = vadd.f32 %v571_v35, %v568_v34  ;;  %v811_v34 = vld [vmem:[%s1720_s5] sm:$0xff]  ;;  %v812_v35 = vld [vmem:[%s1720_s5 + $0x8] sm:$0xff] }
 0x194   :  { %v1264_v26 = vpop.eup %1263  ;;  %v601_v27 = vadd.f32 %v1260_v20, %v600_v21  ;;  %v610_v43 = vadd.f32 %v607_v29, %v604_v28  ;;  %v639_v47 = vmul.f32 %v1262_v22, %v1439_v41  ;;  %v640_v49 = vmul.f32 %v1262_v22, %v1437_v39 }
 0x195   :  { %v635_v31 = vadd.f32 %v1264_v26, %v1262_v22  ;;  %v1266_v32 = vpop.eup %1265  ;;  %v642_v48 = vmul.f32 %v1264_v26, %v1460_v54  ;;  %v643_v51 = vmul.f32 %v1264_v26, %v1458_v53  ;;  %v638_v55 = vmul.f32 %v1262_v22, %v1435_v37 }
 0x196   :  { %1269 = vrcp.f32 %v601_v27  ;;  %v641_v56 = vmul.f32 %v1264_v26, %v1456_v50  ;;  %v613_v57 = vmul.f32 %v1260_v20, %v1485_v9  ;;  %v611_v59 = vadd.f32 %v608_v42, %v605_v40 }
 0x197   :  { %v636_v38 = vadd.f32 %v1266_v32, %v635_v31  ;;  %v609_v60 = vadd.f32 %v606_v46, %v603_v45  ;;  %v581_v61 = vadd.f32 %v578_v33, %v575_v36  ;;  %v577_v41 = vmul.f32 %v1254_v15, %v1483_v5  ;;  %v828_v33 = vld [vmem:[%s1720_s5 + $0x88] sm:$0xff]  ;;  %v829_v36 = vld [vmem:[%s1720_s5 + $0x90] sm:$0xff] }
 0x198   :  { %v616_v54 = vadd.f32 %v613_v57, %v610_v43  ;;  %v582_v63 = vadd.f32 %v579_v58, %v576_v44  ;;  %v614_v39 = vmul.f32 %v1260_v20, %v1481_v4  ;;  %v612_v53 = vmul.f32 %v1260_v20, %v1483_v5  ;;  %v830_v43 = vld [vmem:[%s1720_s5 + $0x98] sm:$0xff]  ;;  %v843_v44 = vld [vmem:[%s1720_s5 + $0x100] sm:$0xff]  ;;  %v844_v45 = vld [vmem:[%s1720_s5 + $0x108] sm:$0xff] }
 0x199   :  { %1271 = vrcp.f32 %v636_v38  ;;  %v645_v0 = vadd.f32 %v642_v48, %v639_v47  ;;  %v646_v37 = vadd.f32 %v643_v51, %v640_v49  ;;  %v580_v1 = vadd.f32 %v577_v41, %v574_v52  ;;  %v665_v51 = vld [vmem:[%s1719_s4] sm:$0xf]  ;;  %v814_v57 = vld [vmem:[%s1720_s5 + $0x18] sm:$0xff] }
 0x19a   :  { %v644_v50 = vadd.f32 %v641_v56, %v638_v55  ;;  %v617_v7 = vadd.f32 %v614_v39, %v611_v59  ;;  %v615_v10 = vadd.f32 %v612_v53, %v609_v60  ;;  %v648_v12 = vmul.f32 %v1266_v32, %v1485_v9  ;;  %v813_v56 = vld [vmem:[%s1720_s5 + $0x10] sm:$0xff]  ;;  %v831_v59 = vld [vmem:[%s1720_s5 + $0xa0] sm:$0xff]  ;;  %v832_v60 = vld [vmem:[%s1720_s5 + $0xa8] sm:$0xff] }
 0x19b   :  { %v649_v13 = vmul.f32 %v1266_v32, %v1481_v4  ;;  %v647_v15 = vmul.f32 %v1266_v32, %v1483_v5  ;;  %v28_v4 = vld [vmem:[%s1715_s0 + $0x8] sm:$0xff]  ;;  %v29_v5 = vld [vmem:[%s1715_s0 + $0x10] sm:$0xff]  ;;  %v827_v32 = vld [vmem:[%s1720_s5 + $0x80] sm:$0xff]  ;;  %v1191_v52 = vpack.c.bf16 %v812_v35, %v811_v34  ;;  %v1193_v55 = vpack.c.bf16 %v830_v43, %v829_v36 }
 0x19c   :  { %v651_v19 = vadd.f32 %v648_v12, %v645_v0  ;;  %v1189_v49 = vpack.c.bf16 %v828_v33, %v827_v32  ;;  %v1222_v58 = vpack.c.bf16 %v844_v45, %v843_v44  ;;  %v846_v41 = vld [vmem:[%s1720_s5 + $0x118] sm:$0xff]  ;;  %v816_v39 = vld [vmem:[%s1720_s5 + $0x28] sm:$0xff]  ;;  %v833_v0 = vld [vmem:[%s1720_s5 + $0xb0] sm:$0xff] }
 0x19d   :  { %v1268_v62 = vpop.eup %1267  ;;  %v652_v20 = vadd.f32 %v649_v13, %v646_v37  ;;  %v650_v21 = vadd.f32 %v647_v15, %v644_v50  ;;  %v834_v37 = vld [vmem:[%s1720_s5 + $0xb8] sm:$0xff]  ;;  %v848_v50 = vld [vmem:[%s1720_s5 + $0x128] sm:$0xff]  ;;  %v835_v12 = vld [vmem:[%s1720_s5 + $0xc0] sm:$0xff] }
 0x19e   :  { %v584_v2 = vmul.f32 %v1268_v62, %v581_v61  ;;  %v585_v6 = vmul.f32 %v1268_v62, %v582_v63  ;;  %v583_v14 = vmul.f32 %v1268_v62, %v580_v1  ;;  %v845_v61 = vld [vmem:[%s1720_s5 + $0x110] sm:$0xff]  ;;  %v1195_v62 = vpack.c.bf16 %v814_v57, %v813_v56  ;;  %v815_v63 = vld [vmem:[%s1720_s5 + $0x20] sm:$0xff]  ;;  %v824_v33 = vld [vmem:[%s1720_s5 + $0x68] sm:$0xff] }
 0x19f   :  { %v1225_v53 = vpack.c.bf16 %v846_v41, %v845_v61  ;;  %v847_v1 = vld [vmem:[%s1720_s5 + $0x120] sm:$0xff]  ;;  %v849_v13 = vld [vmem:[%s1720_s5 + $0x130] sm:$0xff]  ;;  %v842_v36 = vld [vmem:[%s1720_s5 + $0xf8] sm:$0xff] }
 0x1a0   :  { %v1270_v11 = vpop.eup %1269  ;;  %v823_v32 = vld [vmem:[%s1720_s5 + $0x60] sm:$0xff]  ;;  %v841_v35 = vld [vmem:[%s1720_s5 + $0xf0] sm:$0xff]  ;;  %v826_v43 = vld [vmem:[%s1720_s5 + $0x78] sm:$0xff] }
 0x1a1   :  { %v619_v16 = vmul.f32 %v1270_v11, %v616_v54  ;;  %v620_v17 = vmul.f32 %v1270_v11, %v617_v7  ;;  %v618_v18 = vmul.f32 %v1270_v11, %v615_v10  ;;  %v1197_v54 = vpack.c.bf16 %v832_v60, %v831_v59  ;;  %v817_v7 = vld [vmem:[%s1720_s5 + $0x30] sm:$0xff]  ;;  %v818_v10 = vld [vmem:[%s1720_s5 + $0x38] sm:$0xff]  ;;  %v855_v45 = vld [vmem:[%s1720_s5 + $0x160] sm:$0xff] }
 0x1a2   :  { %v1228_v11 = vpack.c.bf16 %v848_v50, %v847_v1  ;;  %v1203_v15 = vpack.c.bf16 %v818_v10, %v817_v7  ;;  %v1043_v41 = vld [vmem:[%s1721_s6] ss:$0 sm:$0xff] }
 0x1a3   :  { %v1272_v22 = vpop.eup %1271  ;;  %v622_v23 = vadd.f32 %v619_v16, %v584_v2  ;;  %v623_v24 = vadd.f32 %v620_v17, %v585_v6  ;;  %v621_v27 = vadd.f32 %v618_v18, %v583_v14  ;;  %v1199_v2 = vpack.c.bf16 %v816_v39, %v815_v63  ;;  %v850_v14 = vld [vmem:[%s1720_s5 + $0x138] sm:$0xff]  ;;  %v819_v17 = vld [vmem:[%s1720_s5 + $0x40] sm:$0xff]  ;;  %v820_v18 = vld [vmem:[%s1720_s5 + $0x48] sm:$0xff] }
 0x1a4   :  { %v654_v25 = vmul.f32 %v1272_v22, %v651_v19  ;;  %v655_v26 = vmul.f32 %v1272_v22, %v652_v20  ;;  %v653_v28 = vmul.f32 %v1272_v22, %v650_v21  ;;  %v1201_v6 = vpack.c.bf16 %v834_v37, %v833_v0  ;;  %v837_v20 = vld [vmem:[%s1720_s5 + $0xd0] sm:$0xff]  ;;  %v838_v21 = vld [vmem:[%s1720_s5 + $0xd8] sm:$0xff]  ;;  %v851_v22 = vld [vmem:[%s1720_s5 + $0x140] sm:$0xff] }
 0x1a5   :  { %v1231_v19 = vpack.c.bf16 %v850_v14, %v849_v13 }
 0x1a6   :  { %v657_v9 = vadd.f32 %v654_v25, %v622_v23  ;;  %v658_v29 = vadd.f32 %v655_v26, %v623_v24  ;;  %v656_v31 = vadd.f32 %v653_v28, %v621_v27  ;;  %v852_v23 = vld [vmem:[%s1720_s5 + $0x148] sm:$0xff]  ;;  %v1207_v24 = vpack.c.bf16 %v820_v18, %v819_v17  ;;  %v821_v26 = vld [vmem:[%s1720_s5 + $0x50] sm:$0xff]  ;;  %v822_v27 = vld [vmem:[%s1720_s5 + $0x58] sm:$0xff] }
 0x1a7   :  { %v1209_v25 = vpack.c.bf16 %v838_v21, %v837_v20  ;;  %v1234_v28 = vpack.c.bf16 %v852_v23, %v851_v22 }
 0x1a8   :  { %v660_v38 = vmul.f32 0.33333334, %v657_v9  ;;  %v661_v40 = vmul.f32 0.33333334, %v658_v29  ;;  %v659_v42 = vmul.f32 0.33333334, %v656_v31 }
 0x1a9   :  { %v853_v9 = vld [vmem:[%s1720_s5 + $0x150] sm:$0xff]  ;;  %v854_v29 = vld [vmem:[%s1720_s5 + $0x158] sm:$0xff] }
 0x1aa   :  { %v663_v46 = vadd.f32 %v660_v38, %v28_v4  ;;  %v664_v47 = vadd.f32 %v661_v40, %v29_v5  ;;  %v662_v48 = vadd.f32 %v659_v42, %v27_v30  ;;  %v839_v4 = vld [vmem:[%s1720_s5 + $0xe0] sm:$0xff]  ;;  %v840_v5 = vld [vmem:[%s1720_s5 + $0xe8] sm:$0xff]  ;;  %v1211_v30 = vpack.c.bf16 %v822_v27, %v821_v26  ;;  %v825_v42 = vld [vmem:[%s1720_s5 + $0x70] sm:$0xff] }
 0x1ab   :  { %v1213_v31 = vpack.c.bf16 %v840_v5, %v839_v4  ;;  %v1237_v34 = vpack.c.bf16 %v854_v29, %v853_v9  ;;  %v1215_v38 = vpack.c.bf16 %v824_v33, %v823_v32  ;;  %v1217_v40 = vpack.c.bf16 %v842_v36, %v841_v35 }
 0x1ac   :  { %670 = vmatprep.subr.mxu0 %v663_v46  ;;  %1129 = vmatpush3.msra.mxu1 %v664_v47  ;;  %v1219_v44 = vpack.c.bf16 %v826_v43, %v825_v42  ;;  %v856_v46 = vld [vmem:[%s1720_s5 + $0x168] sm:$0xff] }
 0x1ad   :  { %671 = vmatpush1.msra.mxu0 %v662_v48  ;;  %1131 = vmatmul.mubr.msk.f32.vlgmr.msra.gmra.mrb[6].mxu1 %vm666_vm2, %v665_v51  ;;  %v1240_v47 = vpack.c.bf16 %v856_v46, %v855_v45  ;;  %v857_v48 = vld [vmem:[%s1720_s5 + $0x170] sm:$0xff] }
 0x1ae   :  { %1041 = vmatmul.mubr.msk.f32.vlgmr.msra.gmra.mrb[6].mxu0 %vm666_vm2, %v665_v51  ;;  %1190 = vmatprep.subr.bf16.mxu0 %v1189_v49  ;;  %v858_v49 = vld [vmem:[%s1720_s5 + $0x178] sm:$0xff] }
 0x1af   :  { %1192 = vmatpush3.bf16.msra.mxu0 %v1191_v52  ;;  %1221 = vmatprep.subr.bf16.mxu1 %v1297_v3  ;;  %v1243_v51 = vpack.c.bf16 %v858_v49, %v857_v48 }
 0x1b0   :  { %1194 = vmatprep.subr.bf16.mxu0 %v1193_v55  ;;  %1223 = vmatpush3.bf16.msra.mxu1 %v1222_v58 }
 0x1b1   :  { %1224 = vmatprep.subr.bf16.mxu1 %v1297_v3  ;;  %1165 = vmatprep.mubr.msk.f32.mxu1 %vm1298_vm0, %v1299_v8  ;;  %v836_v8 = vld [vmem:[%s1720_s5 + $0xc8] sm:$0xff]  ;;  %s1300_s5 = smov [#allocation2]  }
 0x1b2   :  { %v1205_v16 = vpack.c.bf16 %v836_v8, %v835_v12  ;;  %s1013_s8 = sshll.u32 %s1300_s5, 4  ;;  %s1014_s8 = int_to_ptr.vmem [resolvable:$true] %s1013_s8 }
 0x1b3   :  { %1196 = vmatpush3.bf16.msra.mxu0 %v1195_v62  ;;  %s1273_s9 = scalar_lea.vmem %s1014_s8, 64  ;;  %p1278_p1 = scmp.lt.s32.totalorder %s1014_s8, %s1014_s8 }
 0x1b4   :  { %1198 = vmatprep.subr.bf16.mxu0 %v1197_v54  ;;  %1226 = vmatpush3.bf16.msra.mxu1 %v1225_v53  ;;  %p1274_p0 = scmp.ne.s32.totalorder %s1014_s8, %s1273_s9  ;;  %p1279_p2 = scmp.lt.s32.totalorder %s1273_s9, %s1273_s9 }
 0x1b5   :  { %1227 = vmatprep.subr.bf16.mxu1 %v1297_v3 }
 0x1b6   :  { %p1280_p3 = por %p1279_p2, %p1278_p1 }
 0x1b7   :  { %1200 = vmatpush3.bf16.msra.mxu0 %v1199_v2 }
 0x1b8   :  { %1202 = vmatprep.subr.bf16.mxu0 %v1201_v6  ;;  %1229 = vmatpush3.bf16.msra.mxu1 %v1228_v11  ;;  %p1281_p4 = pnand %p1280_p3, %p1274_p0 }
 0x1b9   :  { %1230 = vmatprep.subr.bf16.mxu1 %v1297_v3 }
 0x1bb   :  { %1204 = vmatpush3.bf16.msra.mxu0 %v1203_v15 }
 0x1bc   :  { %1206 = vmatprep.subr.bf16.mxu0 %v1205_v16  ;;  %1232 = vmatpush3.bf16.msra.mxu1 %v1231_v19 }
 0x1bd   :  { %1233 = vmatprep.subr.bf16.mxu1 %v1297_v3 }
 0x1bf   :  { %1208 = vmatpush3.bf16.msra.mxu0 %v1207_v24 }
 0x1c0   :  { %1210 = vmatprep.subr.bf16.mxu0 %v1209_v25  ;;  %1235 = vmatpush3.bf16.msra.mxu1 %v1234_v28 }
 0x1c1   :  { %1236 = vmatprep.subr.bf16.mxu1 %v1297_v3 }
 0x1c3   :  { %1212 = vmatpush3.bf16.msra.mxu0 %v1211_v30 }
 0x1c4   :  { %1214 = vmatprep.subr.bf16.mxu0 %v1213_v31  ;;  %1238 = vmatpush3.bf16.msra.mxu1 %v1237_v34 }
 0x1c5   :  { %1239 = vmatprep.subr.bf16.mxu1 %v1297_v3 }
 0x1c7   :  { %1216 = vmatpush3.bf16.msra.mxu0 %v1215_v38 }
 0x1c8   :  { %1218 = vmatprep.subr.bf16.mxu0 %v1217_v40  ;;  %1241 = vmatpush3.bf16.msra.mxu1 %v1240_v47 }
 0x1c9   :  { %1242 = vmatprep.subr.bf16.mxu1 %v1297_v3 }
 0x1cb   :  { %1220 = vmatpush3.bf16.msra.mxu0 %v1219_v44 }
 0x1cc   :  { %1244 = vmatpush3.bf16.msra.mxu1 %v1243_v51 }
 0x280   :  { %v807_v52 = vpop.f32.mrb[6].mxu1 }
 0x281   :  { %v736_v55 = vpop.f32.mrb[6].mxu0  ;;  %1166 = vmatmul.mubr.f32.vlgmr.msra.gmra.mrb[8].mxu1 %v807_v52  ;;  %v1132_v56 = vpop.f32.mrb[7].mxu1 }
 0x282   :  { %v738_v57 = vpop.f32.mrb[7].mxu0 }
 0x283   :  { %930 = vmatprep.mubr.f32.mxu0 %v738_v57 }
 0x284   :  { %931 = vmatmul.mubr.f32.vlgmr.msra.gmra.mrb[8].mxu0 %v736_v55 }
 0x354   :  { %v1002_v58 = vpop.f32.mrb[8].mxu1 }
 0x355   :  { %v1167_v59 = vpop.f32.mrb[9].mxu1 }
 0x357   :  { %v1087_v60 = vpop.f32.mrb[8].mxu0 }
 0x358   :  { %v1088_v61 = vpop.f32.mrb[9].mxu0 }
 0x359   :  { %v1089_v62 = vadd.f32 %v1088_v61, %v1087_v60 }
 0x35b   :  { %v933_v3 = vadd.f32 %v1089_v62, %v1043_v41 }
 0x35d   :  { %v1003_v54 = vadd.f32 %v1002_v58, %v933_v3 }
 0x35f   :  { %1006 = vst [vmem:[#allocation2] sm:$0xf] %v1003_v54 }
 0x360   :  { %1284 = shalt.err (!%p1281_p4)
}
 0x361   :  { %s1285_s12 = scalar_lea.hbm %s1722_s7, 64 }
 0x362   :  { %p1286_p5 = scmp.ne.s32.totalorder %s1722_s7, %s1285_s12  ;;  %p1289_p6 = scmp.lt.u32.totalorder %s1285_s12, %s1722_s7 }
 0x364   :  { %p1291_p7 = pnand %p1289_p6, %p1286_p5 }
 0x366   :  { %1294 = shalt.err (!%p1291_p7)
}
 0x367   :  { %1016 = dma.vmem_to_hbm [thread:$0]  %s1014_s8, 64, %s1722_s7, [#allocation3]  }
 0x368   :  { %1295 = dma.done.wait [#allocation3], 64  }
 0x369   :  { %1296 = vsyncadd [#allocation3], 4294967232 }
 0x36a   :  { %1020 = vsyncpa [#allocation3], 1 }

</bundles_post_ra>
